<compile_context>
chip_gen: v5e
topology: v5e:2x2
jax: 0.10.0
libtpu: 0.0.40
codegen_flags: <defaults>
</compile_context>

<pallas_src>
import functools

import jax
import jax.numpy as jnp
from jax import lax
from jax.experimental import pallas as pl
from jax.experimental.pallas import tpu as pltpu


# --------------------------------------------------------------------------- #
# Kernels
# --------------------------------------------------------------------------- #
def _ffn_kernel_resident(x_ref, w1_ref, b1_ref, w2_ref, b2_ref, gamma_ref,
                         beta_ref, o_ref, *, eps: float, matmul_dtype):
    """Whole FFN for one row tile; W1/W2 fully resident in VMEM."""
    x_f32 = x_ref[...].astype(jnp.float32)

    # fc1: MXU matmul with bf16 operands, f32 accumulation -> relu (VPU).
    h = jnp.dot(x_f32.astype(matmul_dtype), w1_ref[...],
                preferred_element_type=jnp.float32)
    h = jnp.maximum(h + b1_ref[...].astype(jnp.float32), 0.0)

    # fc2 + residual in f32.
    y = jnp.dot(h.astype(matmul_dtype), w2_ref[...],
                preferred_element_type=jnp.float32)
    y = y + b2_ref[...].astype(jnp.float32) + x_f32

    # LayerNorm over the channel (last) dim: reductions -> XLU, rsqrt -> EUP.
    mean = jnp.mean(y, axis=-1, keepdims=True)
    centered = y - mean
    var = jnp.mean(centered * centered, axis=-1, keepdims=True)
    y = centered * lax.rsqrt(var + eps)
    y = y * gamma_ref[...].astype(jnp.float32) + beta_ref[...].astype(jnp.float32)
    o_ref[...] = y.astype(o_ref.dtype)


def _ffn_kernel_ktiled(x_ref, w1_ref, b1_ref, w2_ref, b2_ref, gamma_ref,
                       beta_ref, o_ref, acc_ref, *, eps: float, matmul_dtype):
    """FFN with the hidden dim split over an 'arbitrary' K grid axis."""
    k = pl.program_id(1)
    nk = pl.num_programs(1)

    @pl.when(k == 0)
    def _init():
        acc_ref[...] = jnp.zeros_like(acc_ref)

    # fc1 chunk: bf16 operands, f32 accumulation -> relu.
    xm = x_ref[...].astype(matmul_dtype)
    h = jnp.dot(xm, w1_ref[...], preferred_element_type=jnp.float32)
    h = jnp.maximum(h + b1_ref[...].astype(jnp.float32), 0.0)

    # fc2 partial over this hidden chunk, accumulated in f32 VMEM scratch.
    acc_ref[...] += jnp.dot(h.astype(matmul_dtype), w2_ref[...],
                            preferred_element_type=jnp.float32)

    @pl.when(k == nk - 1)
    def _finalize():
        x_f32 = x_ref[...].astype(jnp.float32)
        y = acc_ref[...] + b2_ref[...].astype(jnp.float32) + x_f32
        mean = jnp.mean(y, axis=-1, keepdims=True)
        centered = y - mean
        var = jnp.mean(centered * centered, axis=-1, keepdims=True)
        y = centered * lax.rsqrt(var + eps)
        y = y * gamma_ref[...].astype(jnp.float32) + beta_ref[...].astype(jnp.float32)
        o_ref[...] = y.astype(o_ref.dtype)


# --------------------------------------------------------------------------- #
# Wrapper
# --------------------------------------------------------------------------- #
def _default_row_tile() -> int:
    """128 rows saturate v5e's 4x128^2 MXU; v6e/v7x have 2x256^2 MXUs."""
    try:
        kind = jax.devices()[0].device_kind.lower()
    except Exception:
        return 256
    if "v5e" in kind or "v5 lite" in kind or "v5lite" in kind:
        return 128
    return 256


def positionwise_ffn(data, w1, b1, w2, b2, gamma, beta, *,
                     eps: float = 1e-5,
                     row_tile: int | None = None,
                     hidden_tile: int | None = None,
                     matmul_dtype=jnp.bfloat16,
                     resident_vmem_budget: int = 24 << 20,
                     vmem_limit_bytes: int | None = None):
    """data: (B, L, units). w1: (units, hidden), w2: (hidden, units)."""
    B, L, units = data.shape
    hidden = w1.shape[1]
    assert w1.shape == (units, hidden)
    assert w2.shape == (hidden, units)

    # ---- row tiling -------------------------------------------------------- #
    if row_tile is None:
        row_tile = _default_row_tile()
    M = B * L
    # Never tile wider than the (8-aligned) row count — avoids wasted compute
    # on tiny inputs while keeping the second-to-last block dim 8-aligned.
    row_tile = max(8, min(row_tile, pl.cdiv(M, 8) * 8))
    M_pad = pl.cdiv(M, row_tile) * row_tile

    x2d = data.reshape(M, units)
    if M_pad != M:
        x2d = jnp.pad(x2d, ((0, M_pad - M), (0, 0)))

    # ---- operands ---------------------------------------------------------- #
    itemsize_w = jnp.dtype(matmul_dtype).itemsize
    itemsize_x = jnp.dtype(data.dtype).itemsize
    w1_c = w1.astype(matmul_dtype)
    w2_c = w2.astype(matmul_dtype)
    b1_2d = b1.reshape(1, hidden).astype(jnp.float32)
    b2_2d = b2.reshape(1, units).astype(jnp.float32)
    gamma_2d = gamma.reshape(1, units).astype(jnp.float32)
    beta_2d = beta.reshape(1, units).astype(jnp.float32)

    # ---- choose resident vs. K-tiled path ---------------------------------- #
    # VMEM estimate for the resident path (weights double-buffered worst case).
    resident_est = (2 * units * hidden * itemsize_w * 2          # W1 + W2
                    + 2 * row_tile * units * itemsize_x * 2      # x + out tiles
                    + row_tile * hidden * 4                      # f32 intermediate
                    + (hidden + 3 * units) * 4 * 2)              # bias/gamma/beta
    if hidden_tile is None:
        use_resident = resident_est <= resident_vmem_budget
        if not use_resident:
            hidden_tile = next((t for t in (1024, 512, 256, 128)
                                if hidden % t == 0), hidden)
    else:
        if hidden % hidden_tile != 0 or hidden_tile % 128 != 0:
            hidden_tile = hidden
        use_resident = hidden_tile == hidden

    compiler_kwargs = {}
    if vmem_limit_bytes is not None:
        compiler_kwargs["vmem_limit_bytes"] = vmem_limit_bytes

    # ---- RESIDENT path: weights DMA'd from HBM exactly once ---------------- #
    if use_resident:
        kernel = functools.partial(_ffn_kernel_resident, eps=eps,
                                   matmul_dtype=matmul_dtype)
        out2d = pl.pallas_call(
            kernel,
            out_shape=jax.ShapeDtypeStruct((M_pad, units), data.dtype),
            grid_spec=pltpu.PrefetchScalarGridSpec(
                num_scalar_prefetch=0,
                grid=(M_pad // row_tile,),
                in_specs=[
                    pl.BlockSpec((row_tile, units), lambda i: (i, 0)),  # x rows
                    pl.BlockSpec((units, hidden), lambda i: (0, 0)),    # W1 (resident)
                    pl.BlockSpec((1, hidden), lambda i: (0, 0)),        # b1
                    pl.BlockSpec((hidden, units), lambda i: (0, 0)),    # W2 (resident)
                    pl.BlockSpec((1, units), lambda i: (0, 0)),         # b2
                    pl.BlockSpec((1, units), lambda i: (0, 0)),         # gamma
                    pl.BlockSpec((1, units), lambda i: (0, 0)),         # beta
                ],
                out_specs=pl.BlockSpec((row_tile, units), lambda i: (i, 0)),
            ),
            compiler_params=pltpu.CompilerParams(
                dimension_semantics=("parallel",), **compiler_kwargs),
        )(x2d, w1_c, b1_2d, w2_c, b2_2d, gamma_2d, beta_2d)

    # ---- K-TILED path: hidden dim streamed as an 'arbitrary' grid axis ----- #
    else:
        k_steps = hidden // hidden_tile
        kernel = functools.partial(_ffn_kernel_ktiled, eps=eps,
                                   matmul_dtype=matmul_dtype)
        out2d = pl.pallas_call(
            kernel,
            out_shape=jax.ShapeDtypeStruct((M_pad, units), data.dtype),
            grid_spec=pltpu.PrefetchScalarGridSpec(
                num_scalar_prefetch=0,
                grid=(M_pad // row_tile, k_steps),          # rows parallel, K arbitrary
                in_specs=[
                    pl.BlockSpec((row_tile, units), lambda i, k: (i, 0)),     # x rows
                    pl.BlockSpec((units, hidden_tile), lambda i, k: (0, k)),  # W1 slab
                    pl.BlockSpec((1, hidden_tile), lambda i, k: (0, k)),      # b1 slab
                    pl.BlockSpec((hidden_tile, units), lambda i, k: (k, 0)),  # W2 slab
                    pl.BlockSpec((1, units), lambda i, k: (0, 0)),            # b2
                    pl.BlockSpec((1, units), lambda i, k: (0, 0)),            # gamma
                    pl.BlockSpec((1, units), lambda i, k: (0, 0)),            # beta
                ],
                out_specs=pl.BlockSpec((row_tile, units), lambda i, k: (i, 0)),
                scratch_shapes=[pltpu.VMEM((row_tile, units), jnp.float32)],  # fc2 acc
            ),
            compiler_params=pltpu.CompilerParams(
                dimension_semantics=("parallel", "arbitrary"), **compiler_kwargs),
        )(x2d, w1_c, b1_2d, w2_c, b2_2d, gamma_2d, beta_2d)

    if M_pad != M:
        out2d = out2d[:M]
    return out2d.reshape(B, L, units)


# --------------------------------------------------------------------------- #
# Reference + demo
# --------------------------------------------------------------------------- #
def _reference(data, w1, b1, w2, b2, gamma, beta, *, eps=1e-5,
               matmul_dtype=jnp.float32):
    """Pure-JAX reference. matmul_dtype=bf16 mirrors the kernel's MXU path."""
    x = data.astype(jnp.float32)
    h = jnp.dot(x.astype(matmul_dtype), w1.astype(matmul_dtype),
                preferred_element_type=jnp.float32) + b1.astype(jnp.float32)
    h = jnp.maximum(h, 0.0)
    y = jnp.dot(h.astype(matmul_dtype), w2.astype(matmul_dtype),
                preferred_element_type=jnp.float32) + b2.astype(jnp.float32) + x
    mean = jnp.mean(y, axis=-1, keepdims=True)
    var = jnp.mean((y - mean) ** 2, axis=-1, keepdims=True)
    y = (y - mean) * lax.rsqrt(var + eps)
    return (y * gamma + beta).astype(data.dtype)


if __name__ == "__main__":
    # Small but lane-dense shapes consistent with the module: (B, seq_length, C_in).
    B, L, units, hidden = 2, 8, 128, 256

    key = jax.random.PRNGKey(0)
    k_data, k_w1, k_b1, k_w2, k_b2 = jax.random.split(key, 5)

    data = jax.random.normal(k_data, (B, L, units), dtype=jnp.float32)
    # nn.Linear weights stored already transposed as (in, out) for x @ W.
    w1 = jax.random.normal(k_w1, (units, hidden), dtype=jnp.float32) * 0.05
    b1 = jax.random.normal(k_b1, (hidden,), dtype=jnp.float32) * 0.01
    w2 = jax.random.normal(k_w2, (hidden, units), dtype=jnp.float32) * 0.05
    b2 = jax.random.normal(k_b2, (units,), dtype=jnp.float32) * 0.01
    gamma = jnp.ones((units,), dtype=jnp.float32)   # layer_norm weight
    beta = jnp.zeros((units,), dtype=jnp.float32)   # layer_norm bias

    # Matched references: bf16 matmul operands / f32 operands.
    ref_bf16 = _reference(data, w1, b1, w2, b2, gamma, beta,
                          matmul_dtype=jnp.bfloat16)
    ref_f32 = _reference(data, w1, b1, w2, b2, gamma, beta,
                         matmul_dtype=jnp.float32)

    # Path 1: resident-weights kernel (default auto-selection at these shapes).
    out_res = positionwise_ffn(data, w1, b1, w2, b2, gamma, beta)
    out_res = jax.block_until_ready(out_res)
    assert out_res.shape == (B, L, units)
    assert bool(jnp.all(jnp.isfinite(out_res)))
    assert jnp.allclose(out_res, ref_bf16, atol=1e-3, rtol=1e-3), \
        float(jnp.max(jnp.abs(out_res - ref_bf16)))
    assert jnp.allclose(out_res, ref_f32, atol=5e-2, rtol=5e-2), \
        float(jnp.max(jnp.abs(out_res - ref_f32)))

    # Path 2: K-tiled kernel (hidden_tile=128 -> two K steps, exercises the
    # accumulator / init / finalize path).
    out_kt = positionwise_ffn(data, w1, b1, w2, b2, gamma, beta,
                              hidden_tile=128)
    out_kt = jax.block_until_ready(out_kt)
    assert out_kt.shape == (B, L, units)
    assert bool(jnp.all(jnp.isfinite(out_kt)))
    assert jnp.allclose(out_kt, ref_bf16, atol=1e-3, rtol=1e-3), \
        float(jnp.max(jnp.abs(out_kt - ref_bf16)))
    assert jnp.allclose(out_kt, ref_f32, atol=5e-2, rtol=5e-2), \
        float(jnp.max(jnp.abs(out_kt - ref_f32)))

    print("KERNEL_OK")
</pallas_src>

<mosaic_0001>
module attributes {stable_mosaic.version = 11 : i64} {
  func.func @_ffn_kernel_resident(%arg0: i32, %arg1: memref<16x128xf32, #tpu.memory_space<vmem>>, %arg2: memref<128x256xbf16, #tpu.memory_space<vmem>>, %arg3: memref<1x256xf32, #tpu.memory_space<vmem>>, %arg4: memref<256x128xbf16, #tpu.memory_space<vmem>>, %arg5: memref<1x128xf32, #tpu.memory_space<vmem>>, %arg6: memref<1x128xf32, #tpu.memory_space<vmem>>, %arg7: memref<1x128xf32, #tpu.memory_space<vmem>>, %arg8: memref<16x128xf32, #tpu.memory_space<vmem>>) attributes {dimension_semantics = [#tpu.dimension_semantics<parallel>], iteration_bounds = array<i64: 1>, scalar_prefetch = 0 : i64, scratch_operands = 0 : i64, tpu.core_type = #tpu.core_type<tc>, window_params = [{transform_indices = @transform_0, window_bounds = array<i64: 16, 128>}, {pipeline_mode = #tpu.pipeline_mode<synchronous>, transform_indices = @transform_1, window_bounds = array<i64: 128, 256>}, {pipeline_mode = #tpu.pipeline_mode<synchronous>, transform_indices = @transform_2, window_bounds = array<i64: 1, 256>}, {pipeline_mode = #tpu.pipeline_mode<synchronous>, transform_indices = @transform_3, window_bounds = array<i64: 256, 128>}, {pipeline_mode = #tpu.pipeline_mode<synchronous>, transform_indices = @transform_4, window_bounds = array<i64: 1, 128>}, {pipeline_mode = #tpu.pipeline_mode<synchronous>, transform_indices = @transform_5, window_bounds = array<i64: 1, 128>}, {pipeline_mode = #tpu.pipeline_mode<synchronous>, transform_indices = @transform_6, window_bounds = array<i64: 1, 128>}, {transform_indices = @transform_7, window_bounds = array<i64: 16, 128>}]} {
    %c0 = arith.constant 0 : index
    %c0_0 = arith.constant 0 : index
    %0 = vector.load %arg1[%c0, %c0_0] : memref<16x128xf32, #tpu.memory_space<vmem>>, vector<16x128xf32>
    %1 = arith.truncf %0 : vector<16x128xf32> to vector<16x128xbf16>
    %c0_1 = arith.constant 0 : index
    %c0_2 = arith.constant 0 : index
    %2 = vector.load %arg2[%c0_1, %c0_2] : memref<128x256xbf16, #tpu.memory_space<vmem>>, vector<128x256xbf16>
    %cst = arith.constant dense<0.000000e+00> : vector<16x256xf32>
    %3 = tpu.matmul %1, %2, %cst {dimension_numbers = #tpu.dot_dimension_numbers<[1], [0], [0], [1], [0, 0, 1, 1], [], []>} : vector<16x128xbf16>, vector<128x256xbf16>, vector<16x256xf32> -> vector<16x256xf32>
    %c0_3 = arith.constant 0 : index
    %c0_4 = arith.constant 0 : index
    %4 = vector.load %arg3[%c0_3, %c0_4] : memref<1x256xf32, #tpu.memory_space<vmem>>, vector<1x256xf32>
    %5 = vector.broadcast %4 : vector<1x256xf32> to vector<16x256xf32>
    %6 = arith.addf %3, %5 : vector<16x256xf32>
    %cst_5 = arith.constant 0.000000e+00 : f32
    %7 = vector.broadcast %cst_5 : f32 to vector<16x256xf32>
    %8 = arith.maximumf %6, %7 : vector<16x256xf32>
    %9 = arith.truncf %8 : vector<16x256xf32> to vector<16x256xbf16>
    %c0_6 = arith.constant 0 : index
    %c0_7 = arith.constant 0 : index
    %10 = vector.load %arg4[%c0_6, %c0_7] : memref<256x128xbf16, #tpu.memory_space<vmem>>, vector<256x128xbf16>
    %cst_8 = arith.constant dense<0.000000e+00> : vector<16x128xf32>
    %11 = tpu.matmul %9, %10, %cst_8 {dimension_numbers = #tpu.dot_dimension_numbers<[1], [0], [0], [1], [0, 0, 1, 1], [], []>} : vector<16x256xbf16>, vector<256x128xbf16>, vector<16x128xf32> -> vector<16x128xf32>
    %c0_9 = arith.constant 0 : index
    %c0_10 = arith.constant 0 : index
    %12 = vector.load %arg5[%c0_9, %c0_10] : memref<1x128xf32, #tpu.memory_space<vmem>>, vector<1x128xf32>
    %13 = vector.broadcast %12 : vector<1x128xf32> to vector<16x128xf32>
    %14 = arith.addf %11, %13 : vector<16x128xf32>
    %15 = arith.addf %14, %0 : vector<16x128xf32>
    %cst_11 = arith.constant dense<0.000000e+00> : vector<16xf32>
    %16 = vector.multi_reduction <add>, %15, %cst_11 [1] : vector<16x128xf32> to vector<16xf32>
    %17 = vector.shape_cast %16 : vector<16xf32> to vector<16x1xf32>
    %cst_12 = arith.constant 1.280000e+02 : f32
    %18 = vector.broadcast %cst_12 : f32 to vector<16x1xf32>
    %19 = arith.divf %17, %18 : vector<16x1xf32>
    %20 = vector.broadcast %19 : vector<16x1xf32> to vector<16x128xf32>
    %21 = arith.subf %15, %20 : vector<16x128xf32>
    %22 = arith.mulf %21, %21 : vector<16x128xf32>
    %cst_13 = arith.constant dense<0.000000e+00> : vector<16xf32>
    %23 = vector.multi_reduction <add>, %22, %cst_13 [1] : vector<16x128xf32> to vector<16xf32>
    %24 = vector.shape_cast %23 : vector<16xf32> to vector<16x1xf32>
    %cst_14 = arith.constant 1.280000e+02 : f32
    %25 = vector.broadcast %cst_14 : f32 to vector<16x1xf32>
    %26 = arith.divf %24, %25 : vector<16x1xf32>
    %cst_15 = arith.constant 9.99999974E-6 : f32
    %27 = vector.broadcast %cst_15 : f32 to vector<16x1xf32>
    %28 = arith.addf %26, %27 : vector<16x1xf32>
    %29 = math.rsqrt %28 : vector<16x1xf32>
    %30 = vector.broadcast %29 : vector<16x1xf32> to vector<16x128xf32>
    %31 = arith.mulf %21, %30 : vector<16x128xf32>
    %c0_16 = arith.constant 0 : index
    %c0_17 = arith.constant 0 : index
    %32 = vector.load %arg6[%c0_16, %c0_17] : memref<1x128xf32, #tpu.memory_space<vmem>>, vector<1x128xf32>
    %33 = vector.broadcast %32 : vector<1x128xf32> to vector<16x128xf32>
    %34 = arith.mulf %31, %33 : vector<16x128xf32>
    %c0_18 = arith.constant 0 : index
    %c0_19 = arith.constant 0 : index
    %35 = vector.load %arg7[%c0_18, %c0_19] : memref<1x128xf32, #tpu.memory_space<vmem>>, vector<1x128xf32>
    %36 = vector.broadcast %35 : vector<1x128xf32> to vector<16x128xf32>
    %37 = arith.addf %34, %36 : vector<16x128xf32>
    %c0_20 = arith.constant 0 : index
    %c0_21 = arith.constant 0 : index
    %38 = vector.load %arg8[%c0_20, %c0_21] : memref<16x128xf32, #tpu.memory_space<vmem>>, vector<16x128xf32>
    tpu.vector_store %arg8[%c0_20, %c0_21], %37 {strides = array<i32>} : memref<16x128xf32, #tpu.memory_space<vmem>>, vector<16x128xf32>,
    return
  }
  func.func @transform_0(%arg0: i32) -> (i32, i32) {
    %c0_i32 = arith.constant 0 : i32
    %c0_i32_0 = arith.constant 0 : i32
    return %arg0, %c0_i32 : i32, i32
  }
  func.func @transform_1(%arg0: i32) -> (i32, i32) {
    %c0_i32 = arith.constant 0 : i32
    %c0_i32_0 = arith.constant 0 : i32
    %c0_i32_1 = arith.constant 0 : i32
    return %c0_i32, %c0_i32_0 : i32, i32
  }
  func.func @transform_2(%arg0: i32) -> (i32, i32) {
    %c0_i32 = arith.constant 0 : i32
    %c0_i32_0 = arith.constant 0 : i32
    %c0_i32_1 = arith.constant 0 : i32
    return %c0_i32, %c0_i32_0 : i32, i32
  }
  func.func @transform_3(%arg0: i32) -> (i32, i32) {
    %c0_i32 = arith.constant 0 : i32
    %c0_i32_0 = arith.constant 0 : i32
    %c0_i32_1 = arith.constant 0 : i32
    return %c0_i32, %c0_i32_0 : i32, i32
  }
  func.func @transform_4(%arg0: i32) -> (i32, i32) {
    %c0_i32 = arith.constant 0 : i32
    %c0_i32_0 = arith.constant 0 : i32
    %c0_i32_1 = arith.constant 0 : i32
    return %c0_i32, %c0_i32_0 : i32, i32
  }
  func.func @transform_5(%arg0: i32) -> (i32, i32) {
    %c0_i32 = arith.constant 0 : i32
    %c0_i32_0 = arith.constant 0 : i32
    %c0_i32_1 = arith.constant 0 : i32
    return %c0_i32, %c0_i32_0 : i32, i32
  }
  func.func @transform_6(%arg0: i32) -> (i32, i32) {
    %c0_i32 = arith.constant 0 : i32
    %c0_i32_0 = arith.constant 0 : i32
    %c0_i32_1 = arith.constant 0 : i32
    return %c0_i32, %c0_i32_0 : i32, i32
  }
  func.func @transform_7(%arg0: i32) -> (i32, i32) {
    %c0_i32 = arith.constant 0 : i32
    %c0_i32_0 = arith.constant 0 : i32
    return %arg0, %c0_i32 : i32, i32
  }
}

</mosaic_0001>

<bundles_post_ra>
// kernel: tpu_custom_call.1
= control target key start
LH: loop header
LB: loop body
LE: loop exit
PB: predicated region body
PF: predicated region fallthrough
CT: control target
= control target key end

     0   :  { %12 = vsyncpa [#allocation3], 0  ;;  %s861_s0 = inlined_call_operand.hbm [shape: f32[16,128], index: 0, kind: input, shape index: {}]   ;;  %s862_s1 = inlined_call_operand.hbm [shape: bf16[128,256], index: 1, kind: input, shape index: {}]   ;;  %s863_s2 = inlined_call_operand.hbm [shape: f32[1,256], index: 2, kind: input, shape index: {}]   ;;  %s864_s3 = inlined_call_operand.hbm [shape: bf16[256,128], index: 3, kind: input, shape index: {}]   ;;  %s865_s4 = inlined_call_operand.vmem [shape: f32[1,128], index: 4, kind: input, shape index: {}]   ;;  %s866_s5 = inlined_call_operand.vmem [shape: f32[1,128], index: 5, kind: input, shape index: {}]   ;;  %s867_s6 = inlined_call_operand.vmem [shape: f32[1,128], index: 6, kind: input, shape index: {}]   ;;  %s868_s7 = inlined_call_operand.hbm [shape: f32[16,128], index: 7, kind: output, shape index: {}]  }
   0x1   :  { %13 = vsyncpa [#allocation6], 0 }
   0x2   :  { %14 = vsyncpa [#allocation9], 0 }
   0x3   :  { %15 = vsyncpa [#allocation4], 0  ;;  %s33_s26 = sshll.u32 %s862_s1, 4  ;;  %s778_s27 = smov [#allocation5]   ;;  %s34_s26 = int_to_ptr.hbm [resolvable:$true] %s33_s26 }
   0x4   :  { %s35_s28 = sshll.u32 %s778_s27, 4  ;;  %s20_s8 = sshll.u32 %s861_s0, 4  ;;  %s36_s28 = int_to_ptr.vmem [resolvable:$true] %s35_s28  ;;  %s21_s8 = int_to_ptr.hbm [resolvable:$true] %s20_s8 }
   0x5   :  { %s779_s9 = smov 128   ;;  %s780_s10 = smov 8  }
   0x6   :  { %41 = dma.hbm_to_vmem [thread:$0]  %s34_s26, 2048, %s36_s28, [#allocation6], %s779_s9, %s779_s9, %s780_s10  }
   0x7   :  { %s781_s11 = smov [#allocation2]   ;;  %s47_s1 = sshll.u32 %s863_s2, 4  ;;  %s48_s1 = int_to_ptr.hbm [resolvable:$true] %s47_s1 }
   0x8   :  { %s22_s12 = sshll.u32 %s781_s11, 4  ;;  %s57_s16 = sshll.u32 %s864_s3, 4  ;;  %s23_s12 = int_to_ptr.vmem [resolvable:$true] %s22_s12  ;;  %s58_s16 = int_to_ptr.hbm [resolvable:$true] %s57_s16 }
   0x9   :  { %28 = dma.hbm_to_vmem [thread:$0]  %s21_s8, 256, %s23_s12, [#allocation3], %s779_s9, %s779_s9, %s780_s10  }
   0xa   :  { %s782_s17 = smov [#allocation7]   ;;  %s783_s19 = smov [#allocation8]  }
   0xb   :  { %s49_s18 = sshll.u32 %s782_s17, 4  ;;  %s59_s20 = sshll.u32 %s783_s19, 4  ;;  %s50_s18 = int_to_ptr.vmem [resolvable:$true] %s49_s18  ;;  %s60_s20 = int_to_ptr.vmem [resolvable:$true] %s59_s20 }
   0xc   :  { %52 = dma.hbm_to_vmem [thread:$0]  %s48_s1, 32, %s50_s18, [#allocation6]  }
   0xd   :  { %s784_s21 = smov 64   ;;  %s785_s2 = smov 4  }
   0xe   :  { %65 = dma.hbm_to_vmem [thread:$0]  %s58_s16, 2048, %s60_s20, [#allocation9], %s784_s21, %s784_s21, %s785_s2  }
   0xf   :  { %770 = dma.done.wait [#allocation3], 256  }
  0x10   :  { %771 = vsyncadd [#allocation3], 4294967040 }
  0x11   :  { %772 = dma.done.wait [#allocation6], 2080  }
  0x12   :  { %773 = vsyncadd [#allocation6], 4294965216 }
  0x13   :  { %774 = dma.done.wait [#allocation9], 2048  }
  0x14   :  { %775 = vsyncadd [#allocation9], 4294965248  ;;  %v529_v0 = vld [vmem:[#allocation5 + $0x70] sm:$0xf]  ;;  %v614_v1 = vld [vmem:[#allocation5 + $0x74] sm:$0xf0] }
  0x15   :  { %v613_v2 = vld [vmem:[#allocation5 + $0x74] sm:$0xf]  ;;  %v530_v3 = vor.u32 %v614_v1, %v529_v0  ;;  %v531_v4 = vld [vmem:[#allocation5 + $0x78] sm:$0xf0]  ;;  %v521_v5 = vld [vmem:[#allocation5 + $0x60] sm:$0xf] }
  0x16   :  { %v612_v6 = vld [vmem:[#allocation5 + $0x64] sm:$0xf0]  ;;  %v534_v7 = vor.u32 %v613_v2, %v531_v4  ;;  %v611_v8 = vld [vmem:[#allocation5 + $0x64] sm:$0xf]  ;;  %v523_v9 = vld [vmem:[#allocation5 + $0x68] sm:$0xf0] }
  0x17   :  { %193 = vmatpush.bf16.msra.mxu0 %v530_v3  ;;  %v522_v10 = vor.u32 %v612_v6, %v521_v5  ;;  %v526_v11 = vor.u32 %v611_v8, %v523_v9  ;;  %v513_v12 = vld [vmem:[#allocation5 + $0x50] sm:$0xf]  ;;  %v610_v13 = vld [vmem:[#allocation5 + $0x54] sm:$0xf0]  ;;  %v609_v14 = vld [vmem:[#allocation5 + $0x54] sm:$0xf] }
  0x18   :  { %207 = vmatpush.bf16.msra.mxu1 %v534_v7  ;;  %v515_v15 = vld [vmem:[#allocation5 + $0x58] sm:$0xf0]  ;;  %v514_v16 = vor.u32 %v610_v13, %v513_v12  ;;  %v505_v18 = vld [vmem:[#allocation5 + $0x40] sm:$0xf]  ;;  %v608_v19 = vld [vmem:[#allocation5 + $0x44] sm:$0xf0] }
  0x19   :  { %v518_v17 = vor.u32 %v609_v14, %v515_v15  ;;  %v607_v20 = vld [vmem:[#allocation5 + $0x44] sm:$0xf]  ;;  %v507_v21 = vld [vmem:[#allocation5 + $0x48] sm:$0xf0]  ;;  %v506_v22 = vor.u32 %v608_v19, %v505_v18  ;;  %v622_v23 = vld [vmem:[#allocation8 + $0x38] sm:$0xff]  ;;  %s787_s26 = smov [#allocation10]  }
  0x1a   :  { %v630_v24 = vld [vmem:[#allocation8 + $0x78] sm:$0xff]  ;;  %v510_v25 = vor.u32 %v607_v20, %v507_v21  ;;  %v497_v26 = vld [vmem:[#allocation5 + $0x30] sm:$0xf]  ;;  %v605_v28 = vld [vmem:[#allocation5 + $0x34] sm:$0xf]  ;;  %359 = vmatpush.bf16.msra.mxu2 %v622_v23  ;;  %s456_s29 = sshll.u32 %s868_s7, 4  ;;  %s457_s29 = int_to_ptr.hbm [resolvable:$true] %s456_s29 }
  0x1b   :  { %194 = vmatpush.bf16.msra.mxu0 %v522_v10  ;;  %v606_v27 = vld [vmem:[#allocation5 + $0x34] sm:$0xf0]  ;;  %v499_v29 = vld [vmem:[#allocation5 + $0x38] sm:$0xf0]  ;;  %373 = vmatpush.bf16.msra.mxu3 %v630_v24  ;;  %v489_v34 = vld [vmem:[#allocation5 + $0x20] sm:$0xf] }
  0x1c   :  { %208 = vmatpush.bf16.msra.mxu1 %v526_v11  ;;  %v621_v30 = vld [vmem:[#allocation8 + $0x30] sm:$0xff]  ;;  %v498_v32 = vor.u32 %v606_v27, %v497_v26  ;;  %v502_v33 = vor.u32 %v605_v28, %v499_v29  ;;  %v604_v35 = vld [vmem:[#allocation5 + $0x24] sm:$0xf0]  ;;  %v603_v36 = vld [vmem:[#allocation5 + $0x24] sm:$0xf] }
  0x1d   :  { %v629_v31 = vld [vmem:[#allocation8 + $0x70] sm:$0xff]  ;;  %v491_v37 = vld [vmem:[#allocation5 + $0x28] sm:$0xf0]  ;;  %v490_v40 = vor.u32 %v604_v35, %v489_v34  ;;  %v483_v45 = vld [vmem:[#allocation5 + $0x18] sm:$0xf0] }
  0x1e   :  { %360 = vmatpush.bf16.msra.mxu2 %v621_v30  ;;  %v620_v38 = vld [vmem:[#allocation8 + $0x28] sm:$0xff]  ;;  %v494_v41 = vor.u32 %v603_v36, %v491_v37  ;;  %v602_v43 = vld [vmem:[#allocation5 + $0x14] sm:$0xf0]  ;;  %v601_v44 = vld [vmem:[#allocation5 + $0x14] sm:$0xf] }
  0x1f   :  { %195 = vmatpush.bf16.msra.mxu0 %v514_v16  ;;  %374 = vmatpush.bf16.msra.mxu3 %v629_v31  ;;  %v628_v39 = vld [vmem:[#allocation8 + $0x68] sm:$0xff]  ;;  %v619_v46 = vld [vmem:[#allocation8 + $0x20] sm:$0xff]  ;;  %v486_v49 = vor.u32 %v601_v44, %v483_v45  ;;  %v89_v56 = vld [vmem:[#allocation2 + $0x8] sm:$0xff]  ;;  %v786_v31 = vmov 128.0  }
  0x20   :  { %209 = vmatpush.bf16.msra.mxu1 %v518_v17  ;;  %v481_v42 = vld [vmem:[#allocation5 + $0x10] sm:$0xf]  ;;  %v627_v47 = vld [vmem:[#allocation8 + $0x60] sm:$0xff]  ;;  %v475_v53 = vld [vmem:[#allocation5 + $0x8] sm:$0xf0]  ;;  %644 = vrcp.f32 %v786_v31 }
  0x21   :  { %v482_v48 = vor.u32 %v602_v43, %v481_v42  ;;  %v473_v50 = vld [vmem:[#allocation5] sm:$0xf]  ;;  %v600_v51 = vld [vmem:[#allocation5 + $0x4] sm:$0xf0]  ;;  %v599_v52 = vld [vmem:[#allocation5 + $0x4] sm:$0xf] }
  0x22   :  { %361 = vmatpush.bf16.msra.mxu2 %v620_v38  ;;  %v474_v54 = vor.u32 %v600_v51, %v473_v50  ;;  %v88_v55 = vld [vmem:[#allocation2] sm:$0xff]  ;;  %v478_v57 = vor.u32 %v599_v52, %v475_v53  ;;  %v618_v59 = vld [vmem:[#allocation8 + $0x18] sm:$0xff]  ;;  %v615_v1 = vld [vmem:[#allocation8] sm:$0xff] }
  0x23   :  { %196 = vmatpush.bf16.msra.mxu0 %v506_v22  ;;  %375 = vmatpush.bf16.msra.mxu3 %v628_v39  ;;  %v90_v58 = vpack.c.bf16 %v89_v56, %v88_v55  ;;  %v626_v60 = vld [vmem:[#allocation8 + $0x58] sm:$0xff]  ;;  %v617_v61 = vld [vmem:[#allocation8 + $0x10] sm:$0xff]  ;;  %v616_v63 = vld [vmem:[#allocation8 + $0x8] sm:$0xff] }
  0x24   :  { %210 = vmatpush.bf16.msra.mxu1 %v510_v25  ;;  %v625_v62 = vld [vmem:[#allocation8 + $0x50] sm:$0xff]  ;;  %v624_v0 = vld [vmem:[#allocation8 + $0x48] sm:$0xff]  ;;  %v623_v2 = vld [vmem:[#allocation8 + $0x40] sm:$0xff] }
  0x25   :  { %v107_v3 = vld [vmem:[#allocation7] sm:$0x3]  ;;  %v641_v20 = vld [vmem:[%s865_s4] ss:$0 sm:$0xff] }
  0x26   :  { %362 = vmatpush.bf16.msra.mxu2 %v619_v46  ;;  %v109_v6 = vperm.slane %v107_v3, 0  ;;  %v110_v7 = vperm.slane %v107_v3, 1 }
  0x27   :  { %197 = vmatpush.bf16.msra.mxu0 %v498_v32  ;;  %376 = vmatpush.bf16.msra.mxu3 %v627_v47  ;;  %v645_v32 = vpop.eup %644 }
  0x28   :  { %211 = vmatpush.bf16.msra.mxu1 %v502_v33  ;;  %v394_v33 = vmul.f32 128.0, %v645_v32  ;;  %vm398_vm0 = vweird.f32 %v645_v32 }
  0x2a   :  { %363 = vmatpush.bf16.msra.mxu2 %v618_v59  ;;  %v395_v34 = vsub.f32 1.0, %v394_v33 }
  0x2b   :  { %198 = vmatpush.bf16.msra.mxu0 %v490_v40  ;;  %377 = vmatpush.bf16.msra.mxu3 %v626_v60  ;;  %v642_v60 = vld [vmem:[%s866_s5] ss:$0 sm:$0xff]  ;;  %s454_s5 = sshll.u32 %s787_s26, 4  ;;  %s455_s5 = int_to_ptr.vmem [resolvable:$true] %s454_s5 }
  0x2c   :  { %212 = vmatpush.bf16.msra.mxu1 %v494_v41  ;;  %v396_v35 = vmul.f32 %v645_v32, %v395_v34 }
  0x2e   :  { %364 = vmatpush.bf16.msra.mxu2 %v617_v61  ;;  %v397_v36 = vadd.f32 %v645_v32, %v396_v35 }
  0x2f   :  { %199 = vmatpush.bf16.msra.mxu0 %v482_v48  ;;  %378 = vmatpush.bf16.msra.mxu3 %v625_v62 }
  0x30   :  { %213 = vmatpush.bf16.msra.mxu1 %v486_v49  ;;  %v399_v37 = vsel %vm398_vm0, %v645_v32, %v397_v36 }
  0x32   :  { %365 = vmatpush.bf16.msra.mxu2 %v616_v63 }
  0x33   :  { %200 = vmatpush.bf16.msra.mxu0 %v474_v54  ;;  %379 = vmatpush.bf16.msra.mxu3 %v624_v0  ;;  %v643_v0 = vld [vmem:[%s867_s6] ss:$0 sm:$0xff] }
  0x34   :  { %214 = vmatpush.bf16.msra.mxu1 %v478_v57 }
  0x36   :  { %201 = vmatmul.bf16.vlgmr.msra.gmra.mxu0 %v90_v58  ;;  %366 = vmatpush.bf16.msra.mxu2 %v615_v1 }
  0x37   :  { %215 = vmatmul.bf16.vlgmr.msra.gmra.mxu1 %v90_v58  ;;  %380 = vmatpush.bf16.msra.mxu3 %v623_v2 }
  0xb3   :  { %v202_v4 = vpop.f32.mrf.mxu0 }
  0xb4   :  { %v216_v5 = vpop.f32.mrf.mxu1  ;;  %v203_v8 = vadd.f32 %v202_v4, %v109_v6 }
  0xb5   :  { %v217_v9 = vadd.f32 %v216_v5, %v110_v7 }
  0xb6   :  { %v221_v14 = vmax.f32 %v203_v8, 0.0 }
  0xb7   :  { %v222_v16 = vmax.f32 %v217_v9, 0.0 }
  0xbb   :  { %v204_v10 = vpop.f32.mrf.mxu0 }
  0xbc   :  { %v205_v11 = vadd.f32 %v204_v10, %v109_v6  ;;  %v218_v12 = vpop.f32.mrf.mxu1 }
  0xbd   :  { %v219_v13 = vadd.f32 %v218_v12, %v110_v7 }
  0xbe   :  { %v223_v15 = vmax.f32 %v205_v11, 0.0 }
  0xbf   :  { %v224_v17 = vmax.f32 %v219_v13, 0.0 }
  0xc0   :  { %v225_v18 = vpack.c.bf16 %v223_v15, %v221_v14 }
  0xc1   :  { %v226_v19 = vpack.c.bf16 %v224_v17, %v222_v16 }
  0xc2   :  { %367 = vmatmul.bf16.vlgmr.msra.gmra.mxu2 %v225_v18 }
  0xc3   :  { %381 = vmatmul.bf16.vlgmr.msra.gmra.mxu3 %v226_v19 }
 0x145   :  { %v368_v21 = vpop.f32.mrf.mxu2 }
 0x146   :  { %v369_v22 = vadd.f32 %v641_v20, %v368_v21  ;;  %v382_v23 = vpop.f32.mrf.mxu3 }
 0x148   :  { %v383_v24 = vadd.f32 %v382_v23, %v369_v22 }
 0x14a   :  { %v387_v25 = vadd.f32 %v383_v24, %v88_v55 }
 0x14c   :  { %389 = vadd.xlane.f32.xlu0 %v387_v25 }
 0x14d   :  { %v370_v26 = vpop.f32.mrf.mxu2 }
 0x14e   :  { %v371_v27 = vadd.f32 %v641_v20, %v370_v26  ;;  %v384_v28 = vpop.f32.mrf.mxu3 }
 0x150   :  { %v385_v29 = vadd.f32 %v384_v28, %v371_v27 }
 0x152   :  { %v388_v30 = vadd.f32 %v385_v29, %v89_v56 }
 0x154   :  { %391 = vadd.xlane.f32.xlu0 %v388_v30 }
 0x1bf   :  { %v390_v38 = vpop.xlane.xlu0 %389 }
 0x1c0   :  { %v400_v39 = vmul.f32 %v399_v37, %v390_v38 }
 0x1c2   :  { %v402_v40 = vsub.f32 %v387_v25, %v400_v39 }
 0x1c4   :  { %v404_v41 = vmul.f32 %v402_v40, %v402_v40 }
 0x1c6   :  { %406 = vadd.xlane.f32.xlu1 %v404_v41 }
 0x1c7   :  { %v392_v42 = vpop.xlane.xlu0 %391 }
 0x1c8   :  { %v401_v43 = vmul.f32 %v399_v37, %v392_v42 }
 0x1ca   :  { %v403_v44 = vsub.f32 %v388_v30, %v401_v43 }
 0x1cc   :  { %v405_v45 = vmul.f32 %v403_v44, %v403_v44 }
 0x1ce   :  { %408 = vadd.xlane.f32.xlu1 %v405_v45 }
 0x239   :  { %v407_v46 = vpop.xlane.xlu1 %406 }
 0x23a   :  { %v410_v47 = vmul.f32 %v407_v46, %v399_v37 }
 0x23c   :  { %v412_v48 = vadd.f32 1e-05, %v410_v47 }
 0x23e   :  { %646 = vrsqrt.f32 %v412_v48  ;;  %vm420_vm2 = vweird.f32 %v412_v48 }
 0x241   :  { %v409_v49 = vpop.xlane.xlu1 %408 }
 0x242   :  { %v411_v50 = vmul.f32 %v409_v49, %v399_v37 }
 0x244   :  { %v647_v51 = vpop.eup %646  ;;  %v413_v52 = vadd.f32 1e-05, %v411_v50 }
 0x245   :  { %v415_v53 = vmul.f32 %v647_v51, %v412_v48  ;;  %vm421_vm1 = vweird.f32 %v647_v51 }
 0x246   :  { %648 = vrsqrt.f32 %v413_v52  ;;  %vm422_vm3 = vmor %vm420_vm2, %vm421_vm1  ;;  %vm430_vm5 = vweird.f32 %v413_v52 }
 0x247   :  { %v416_v54 = vmul.f32 %v647_v51, %v415_v53 }
 0x249   :  { %v417_v55 = vmul.f32 0.5, %v416_v54 }
 0x24b   :  { %v418_v56 = vsub.f32 1.5, %v417_v55 }
 0x24c   :  { %v649_v57 = vpop.eup %648 }
 0x24d   :  { %v419_v58 = vmul.f32 %v647_v51, %v418_v56  ;;  %v425_v59 = vmul.f32 %v649_v57, %v413_v52  ;;  %vm431_vm4 = vweird.f32 %v649_v57 }
 0x24e   :  { %vm432_vm6 = vmor %vm430_vm5, %vm431_vm4 }
 0x24f   :  { %v423_v61 = vsel %vm422_vm3, %v647_v51, %v419_v58  ;;  %v426_v62 = vmul.f32 %v649_v57, %v425_v59 }
 0x250   :  { %v434_v63 = vmul.f32 %v423_v61, %v402_v40 }
 0x251   :  { %v427_v1 = vmul.f32 0.5, %v426_v62 }
 0x252   :  { %v440_v2 = vmul.f32 %v642_v60, %v434_v63 }
 0x253   :  { %v428_v3 = vsub.f32 1.5, %v427_v1 }
 0x254   :  { %v446_v4 = vadd.f32 %v643_v0, %v440_v2 }
 0x255   :  { %v429_v5 = vmul.f32 %v649_v57, %v428_v3 }
 0x256   :  { %448 = vst [vmem:[#allocation10] sm:$0xff] %v446_v4 }
 0x257   :  { %v433_v6 = vsel %vm432_vm6, %v649_v57, %v429_v5 }
 0x258   :  { %v435_v7 = vmul.f32 %v433_v6, %v403_v44 }
 0x25a   :  { %v441_v8 = vmul.f32 %v642_v60, %v435_v7 }
 0x25c   :  { %v447_v9 = vadd.f32 %v643_v0, %v441_v8 }
 0x25e   :  { %449 = vst [vmem:[#allocation10 + $0x8] sm:$0xff] %v447_v9 }
 0x25f   :  { %462 = dma.vmem_to_hbm [thread:$0]  %s455_s5, 256, %s457_s29, [#allocation4], %s779_s9, %s779_s9, %s780_s10  }
 0x260   :  { %776 = dma.done.wait [#allocation4], 256  }
 0x261   :  { %777 = vsyncadd [#allocation4], 4294967040 }
 0x262   :  { %467 = vsyncpa [#allocation3], 1 }
 0x263   :  { %468 = vsyncpa [#allocation6], 1 }
 0x264   :  { %469 = vsyncpa [#allocation9], 1 }
 0x265   :  { %470 = vsyncpa [#allocation4], 1 }

</bundles_post_ra>
